<compile_context>
chip_gen: v7x
topology: tpu7x:2x2x1
jax: 0.10.0
libtpu: 0.0.40
codegen_flags: <defaults>
</compile_context>

<pallas_src>
import functools

import jax
import jax.numpy as jnp
from jax.experimental import pallas as pl
from jax.experimental.pallas import tpu as pltpu


def classifier_kernel(x_ref, w1_ref, b1_ref, w2_ref, b2_ref, o_ref):
    # x_ref : [TB, H]      bf16  CLS embeddings for one batch tile
    # w1_ref: [H, H]       bf16  first linear weight (in x out), VMEM-resident
    # b1_ref: [1, H]       f32
    # w2_ref: [H, C_pad]   bf16  second linear weight, classes padded to 128 lanes
    # b2_ref: [1, C_pad]   f32   (padded region is zero)
    # o_ref : [TB, C_pad]  f32   logits (padded classes sliced off outside)
    x = x_ref[...].astype(w1_ref.dtype)          # no-op when already bf16

    # Dropout(0.1) -> identity at inference time.
    h = jnp.dot(x, w1_ref[...], preferred_element_type=jnp.float32)
    h = jnp.maximum(h + b1_ref[...], 0.0)        # bias + ReLU in f32

    logits = jnp.dot(h.astype(w2_ref.dtype), w2_ref[...],
                     preferred_element_type=jnp.float32) + b2_ref[...]
    o_ref[...] = logits.astype(o_ref.dtype)


def _round_up(x, m):
    return (x + m - 1) // m * m


@jax.jit
def text_classifier_head(last_hidden_state, w1, b1, w2, b2):
    """CLS pooling + 2-layer MLP head as a single batch-tiled Pallas kernel."""
    B, S, H = last_hidden_state.shape
    H2, C = w2.shape
    assert w1.shape == (H, H) and H2 == H

    C_pad = _round_up(C, 128)         # lane-dense output width
    TB = min(B, 128)                  # batch tile; grid covers the rest

    # One-time layout prep (in practice done once at weight-load time):
    # bf16 weights halve the dominant W1 HBM stream; W2/b2 zero-padded on the
    # class dim so output stores are unmasked; biases kept in f32.
    w1 = w1.astype(jnp.bfloat16)
    w2p = jnp.zeros((H, C_pad), jnp.bfloat16).at[:, :C].set(w2.astype(jnp.bfloat16))
    b1r = b1.astype(jnp.float32).reshape(1, H)
    b2p = jnp.zeros((1, C_pad), jnp.float32).at[0, :C].set(b2.astype(jnp.float32))

    if H % 128 == 0:
        # Fused CLS pooling: view [B, S, H] as [B, S*H] (free reshape of a
        # contiguous array).  The CLS embedding of batch row b occupies columns
        # [0:H], so the BlockSpec DMA fetches exactly the CLS rows.
        x = last_hidden_state.reshape(B, S * H)
    else:
        # TODO(synk): for H not a multiple of 128 fall back to a wrapper-side
        # CLS slice to keep block shapes lane-aligned.
        x = last_hidden_state[:, 0, :]
    x_spec = pl.BlockSpec((TB, H), lambda i: (i, 0))

    grid = (pl.cdiv(B, TB),)

    # VMEM budget: double-buffered activation/output tiles + resident params.
    bf16_sz = jnp.dtype(jnp.bfloat16).itemsize
    block_bytes = (2 * TB * H * bf16_sz            # x tiles (double-buffered)
                   + 2 * TB * C_pad * 4            # output tiles
                   + 2 * (H * H + H * C_pad) * bf16_sz   # weights
                   + 2 * (H + C_pad) * 4)                 # biases
    vmem_limit = int(min(max(2 * block_bytes, 16 << 20), 48 << 20))

    out = pl.pallas_call(
        classifier_kernel,
        out_shape=jax.ShapeDtypeStruct((B, C_pad), jnp.float32),
        grid=grid,
        in_specs=[
            x_spec,                                         # CLS rows, tiled over batch
            pl.BlockSpec((H, H), lambda i: (0, 0)),         # W1: fetched once, resident
            pl.BlockSpec((1, H), lambda i: (0, 0)),         # b1
            pl.BlockSpec((H, C_pad), lambda i: (0, 0)),     # W2 (padded)
            pl.BlockSpec((1, C_pad), lambda i: (0, 0)),     # b2 (padded)
        ],
        out_specs=pl.BlockSpec((TB, C_pad), lambda i: (i, 0)),
        compiler_params=pltpu.CompilerParams(
            dimension_semantics=("parallel",),
            vmem_limit_bytes=vmem_limit),
    )(x, w1, b1r, w2p, b2p)

    return out[:, :C]


if __name__ == "__main__":
    # Small shapes consistent with the module: batch=2, seq=8, hidden=128,
    # num_classes=10 (hidden kept a multiple of 128 like real encoder widths).
    B, S, H, C = 2, 8, 128, 10

    key = jax.random.PRNGKey(0)
    k_x, k_w1, k_b1, k_w2, k_b2 = jax.random.split(key, 5)

    # Synthetic backbone output (stands in for model(**inputs).last_hidden_state),
    # emitted in bf16 as a real encoder would.
    last_hidden_state = jax.random.normal(
        k_x, (B, S, H), dtype=jnp.float32).astype(jnp.bfloat16)

    scale = 1.0 / jnp.sqrt(H)
    w1 = (jax.random.uniform(k_w1, (H, H), jnp.float32, -1.0, 1.0) * scale
          ).astype(jnp.bfloat16)
    b1 = jax.random.uniform(k_b1, (H,), jnp.float32, -1.0, 1.0) * scale
    w2 = (jax.random.uniform(k_w2, (H, C), jnp.float32, -1.0, 1.0) * scale
          ).astype(jnp.bfloat16)
    b2 = jax.random.uniform(k_b2, (C,), jnp.float32, -1.0, 1.0) * scale

    logits = text_classifier_head(last_hidden_state, w1, b1, w2, b2)
    logits = jax.block_until_ready(logits)

    # Dtype-matched pure-JAX reference (bf16 matmuls, f32 accumulate + bias).
    cls = last_hidden_state[:, 0, :]
    h_ref = jnp.dot(cls, w1, preferred_element_type=jnp.float32) + b1
    h_ref = jnp.maximum(h_ref, 0.0).astype(jnp.bfloat16)
    ref = jnp.dot(h_ref, w2, preferred_element_type=jnp.float32) + b2

    assert logits.shape == (B, C)
    assert jnp.allclose(logits, ref, atol=1e-3, rtol=1e-2), float(
        jnp.max(jnp.abs(logits - ref)))

    print("KERNEL_OK")
</pallas_src>

<mosaic_0001>
module attributes {stable_mosaic.version = 11 : i64} {
  func.func @classifier_kernel(%arg0: i32, %arg1: memref<2x128xbf16, #tpu.memory_space<vmem>>, %arg2: memref<128x128xbf16, #tpu.memory_space<vmem>>, %arg3: memref<1x128xf32, #tpu.memory_space<vmem>>, %arg4: memref<128x128xbf16, #tpu.memory_space<vmem>>, %arg5: memref<1x128xf32, #tpu.memory_space<vmem>>, %arg6: memref<2x128xf32, #tpu.memory_space<vmem>>) attributes {dimension_semantics = [#tpu.dimension_semantics<parallel>], iteration_bounds = array<i64: 1>, scalar_prefetch = 0 : i64, scratch_operands = 0 : i64, tpu.core_type = #tpu.core_type<tc>, window_params = [{transform_indices = @transform_0, window_bounds = array<i64: 2, 128>}, {pipeline_mode = #tpu.pipeline_mode<synchronous>, transform_indices = @transform_1, window_bounds = array<i64: 128, 128>}, {pipeline_mode = #tpu.pipeline_mode<synchronous>, transform_indices = @transform_2, window_bounds = array<i64: 1, 128>}, {pipeline_mode = #tpu.pipeline_mode<synchronous>, transform_indices = @transform_3, window_bounds = array<i64: 128, 128>}, {pipeline_mode = #tpu.pipeline_mode<synchronous>, transform_indices = @transform_4, window_bounds = array<i64: 1, 128>}, {transform_indices = @transform_5, window_bounds = array<i64: 2, 128>}]} {
    %c0 = arith.constant 0 : index
    %c0_0 = arith.constant 0 : index
    %0 = vector.load %arg1[%c0, %c0_0] : memref<2x128xbf16, #tpu.memory_space<vmem>>, vector<2x128xbf16>
    %c0_1 = arith.constant 0 : index
    %c0_2 = arith.constant 0 : index
    %1 = vector.load %arg2[%c0_1, %c0_2] : memref<128x128xbf16, #tpu.memory_space<vmem>>, vector<128x128xbf16>
    %cst = arith.constant dense<0.000000e+00> : vector<2x128xf32>
    %2 = tpu.matmul %0, %1, %cst {dimension_numbers = #tpu.dot_dimension_numbers<[1], [0], [0], [1], [0, 0, 1, 1], [], []>} : vector<2x128xbf16>, vector<128x128xbf16>, vector<2x128xf32> -> vector<2x128xf32>
    %c0_3 = arith.constant 0 : index
    %c0_4 = arith.constant 0 : index
    %3 = vector.load %arg3[%c0_3, %c0_4] : memref<1x128xf32, #tpu.memory_space<vmem>>, vector<1x128xf32>
    %4 = vector.broadcast %3 : vector<1x128xf32> to vector<2x128xf32>
    %5 = arith.addf %2, %4 : vector<2x128xf32>
    %cst_5 = arith.constant 0.000000e+00 : f32
    %6 = vector.broadcast %cst_5 : f32 to vector<2x128xf32>
    %7 = arith.maximumf %5, %6 : vector<2x128xf32>
    %8 = arith.truncf %7 : vector<2x128xf32> to vector<2x128xbf16>
    %c0_6 = arith.constant 0 : index
    %c0_7 = arith.constant 0 : index
    %9 = vector.load %arg4[%c0_6, %c0_7] : memref<128x128xbf16, #tpu.memory_space<vmem>>, vector<128x128xbf16>
    %cst_8 = arith.constant dense<0.000000e+00> : vector<2x128xf32>
    %10 = tpu.matmul %8, %9, %cst_8 {dimension_numbers = #tpu.dot_dimension_numbers<[1], [0], [0], [1], [0, 0, 1, 1], [], []>} : vector<2x128xbf16>, vector<128x128xbf16>, vector<2x128xf32> -> vector<2x128xf32>
    %c0_9 = arith.constant 0 : index
    %c0_10 = arith.constant 0 : index
    %11 = vector.load %arg5[%c0_9, %c0_10] : memref<1x128xf32, #tpu.memory_space<vmem>>, vector<1x128xf32>
    %12 = vector.broadcast %11 : vector<1x128xf32> to vector<2x128xf32>
    %13 = arith.addf %10, %12 : vector<2x128xf32>
    %c0_11 = arith.constant 0 : index
    %c0_12 = arith.constant 0 : index
    %14 = vector.load %arg6[%c0_11, %c0_12] : memref<2x128xf32, #tpu.memory_space<vmem>>, vector<2x128xf32>
    tpu.vector_store %arg6[%c0_11, %c0_12], %13 {strides = array<i32>} : memref<2x128xf32, #tpu.memory_space<vmem>>, vector<2x128xf32>,
    return
  }
  func.func @transform_0(%arg0: i32) -> (i32, i32) {
    %c0_i32 = arith.constant 0 : i32
    %c0_i32_0 = arith.constant 0 : i32
    return %arg0, %c0_i32 : i32, i32
  }
  func.func @transform_1(%arg0: i32) -> (i32, i32) {
    %c0_i32 = arith.constant 0 : i32
    %c0_i32_0 = arith.constant 0 : i32
    %c0_i32_1 = arith.constant 0 : i32
    return %c0_i32, %c0_i32_0 : i32, i32
  }
  func.func @transform_2(%arg0: i32) -> (i32, i32) {
    %c0_i32 = arith.constant 0 : i32
    %c0_i32_0 = arith.constant 0 : i32
    %c0_i32_1 = arith.constant 0 : i32
    return %c0_i32, %c0_i32_0 : i32, i32
  }
  func.func @transform_3(%arg0: i32) -> (i32, i32) {
    %c0_i32 = arith.constant 0 : i32
    %c0_i32_0 = arith.constant 0 : i32
    %c0_i32_1 = arith.constant 0 : i32
    return %c0_i32, %c0_i32_0 : i32, i32
  }
  func.func @transform_4(%arg0: i32) -> (i32, i32) {
    %c0_i32 = arith.constant 0 : i32
    %c0_i32_0 = arith.constant 0 : i32
    %c0_i32_1 = arith.constant 0 : i32
    return %c0_i32, %c0_i32_0 : i32, i32
  }
  func.func @transform_5(%arg0: i32) -> (i32, i32) {
    %c0_i32 = arith.constant 0 : i32
    %c0_i32_0 = arith.constant 0 : i32
    return %arg0, %c0_i32 : i32, i32
  }
}

</mosaic_0001>

<bundles_post_ra>
// kernel: text_classifier_head.1
= control target key start
LH: loop header
LB: loop body
LE: loop exit
PB: predicated region body
PF: predicated region fallthrough
CT: control target
= control target key end

     0   :  { %v381_v1 = vmov 0.0   ;;  %vm382_vm0 = vmmov 0   ;;  %s483_s0 = inlined_call_operand.vmem [shape: bf16[2,1024], index: 0, kind: input, shape index: {}]   ;;  %s484_s1 = inlined_call_operand.vmem [shape: bf16[128,128], index: 1, kind: input, shape index: {}]   ;;  %s485_s2 = inlined_call_operand.vmem [shape: f32[1,128], index: 2, kind: input, shape index: {}]   ;;  %s486_s3 = inlined_call_operand.vmem [shape: bf16[128,128], index: 3, kind: input, shape index: {}]   ;;  %s487_s4 = inlined_call_operand.vmem [shape: f32[1,128], index: 4, kind: input, shape index: {}]   ;;  %s488_s5 = inlined_call_operand.hbm [shape: f32[2,128], index: 5, kind: output, shape index: {}]  }
   0x1   :  { %v341_v0 = vld [vmem:[%s484_s1] sm:$0xff]   ;;  %298 = vmatprep.subr.bf16.mxu0 %v381_v1  ;;  %318 = vmatprep.subr.bf16.mxu1 %v381_v1  ;;  %v342_v2 = vld [vmem:[%s484_s1 + $0x8] sm:$0xff]   ;;  %v343_v3 = vld [vmem:[%s484_s1 + $0x10] sm:$0xff]  }
   0x2   :  { %299 = vmatpush3.bf16.msra.mxu0 %v341_v0  ;;  %314 = vmatprep.mubr.msk.bf16.mxu0 %vm382_vm0, %v381_v1  ;;  %v349_v4 = vld [vmem:[%s486_s3] sm:$0xff]   ;;  %v344_v5 = vld [vmem:[%s484_s1 + $0x18] sm:$0xff]   ;;  %v350_v6 = vld [vmem:[%s486_s3 + $0x8] sm:$0xff]  }
   0x3   :  { %300 = vmatprep.subr.bf16.mxu0 %v381_v1  ;;  %334 = vmatprep.mubr.msk.bf16.mxu1 %vm382_vm0, %v381_v1  ;;  %v345_v7 = vld [vmem:[%s484_s1 + $0x20] sm:$0xff]   ;;  %v351_v8 = vld [vmem:[%s486_s3 + $0x10] sm:$0xff]  }
   0x4   :  { %319 = vmatpush3.bf16.msra.mxu1 %v349_v4 }
   0x5   :  { %320 = vmatprep.subr.bf16.mxu1 %v381_v1 }
   0x6   :  { %301 = vmatpush3.bf16.msra.mxu0 %v342_v2 }
   0x7   :  { %302 = vmatprep.subr.bf16.mxu0 %v381_v1 }
   0x8   :  { %321 = vmatpush3.bf16.msra.mxu1 %v350_v6 }
   0x9   :  { %322 = vmatprep.subr.bf16.mxu1 %v381_v1 }
   0xa   :  { %303 = vmatpush3.bf16.msra.mxu0 %v343_v3 }
   0xb   :  { %304 = vmatprep.subr.bf16.mxu0 %v381_v1 }
   0xe   :  { %305 = vmatpush3.bf16.msra.mxu0 %v344_v5 }
   0xf   :  { %306 = vmatprep.subr.bf16.mxu0 %v381_v1 }
  0x10   :  { %10 = vsyncpa [#allocation3], 0  ;;  %v346_v9 = vld [vmem:[%s484_s1 + $0x28] sm:$0xff]   ;;  %323 = vmatpush3.bf16.msra.mxu1 %v351_v8  ;;  %v352_v10 = vld [vmem:[%s486_s3 + $0x18] sm:$0xff]   ;;  %s383_s29 = smov [#allocation2]  }
  0x11   :  { %324 = vmatprep.subr.bf16.mxu1 %v381_v1  ;;  %v347_v11 = vld [vmem:[%s484_s1 + $0x30] sm:$0xff]   ;;  %v353_v12 = vld [vmem:[%s486_s3 + $0x20] sm:$0xff]   ;;  %v348_v13 = vld [vmem:[%s484_s1 + $0x38] sm:$0xff]   ;;  %s254_s30 = sshll.u32 %s383_s29, 4  ;;  %s255_s30 = int_to_ptr.vmem [resolvable:$true] %s254_s30 }
  0x12   :  { %307 = vmatpush3.bf16.msra.mxu0 %v345_v7  ;;  %v354_v14 = vld [vmem:[%s486_s3 + $0x28] sm:$0xff]   ;;  %v22_v15 = vld [vmem:[%s483_s0] sm:$0x1]  ;;  %v355_v16 = vld [vmem:[%s486_s3 + $0x30] sm:$0xff]   ;;  %p362_p1 = scmp.lt.s32.totalorder %s255_s30, %s255_s30 }
  0x13   :  { %308 = vmatprep.subr.bf16.mxu0 %v381_v1  ;;  %v356_v17 = vld [vmem:[%s486_s3 + $0x38] sm:$0xff]   ;;  %v262_v18 = vld [vmem:[%s485_s2] ss:$0 sm:$0xff]  ;;  %s357_s2 = scalar_lea.vmem %s255_s30, 32 }
  0x14   :  { %325 = vmatpush3.bf16.msra.mxu1 %v352_v10  ;;  %v271_v26 = vld [vmem:[%s487_s4] ss:$0 sm:$0xff]  ;;  %p358_p0 = scmp.ne.s32.totalorder %s255_s30, %s357_s2  ;;  %p363_p2 = scmp.lt.s32.totalorder %s357_s2, %s357_s2 }
  0x15   :  { %326 = vmatprep.subr.bf16.mxu1 %v381_v1 }
  0x16   :  { %309 = vmatpush3.bf16.msra.mxu0 %v346_v9  ;;  %p364_p3 = por %p363_p2, %p362_p1 }
  0x17   :  { %310 = vmatprep.subr.bf16.mxu0 %v381_v1 }
  0x18   :  { %327 = vmatpush3.bf16.msra.mxu1 %v353_v12  ;;  %p365_p4 = pnand %p364_p3, %p358_p0 }
  0x19   :  { %328 = vmatprep.subr.bf16.mxu1 %v381_v1 }
  0x1a   :  { %311 = vmatpush3.bf16.msra.mxu0 %v347_v11 }
  0x1b   :  { %312 = vmatprep.subr.bf16.mxu0 %v381_v1 }
  0x1c   :  { %329 = vmatpush3.bf16.msra.mxu1 %v354_v14 }
  0x1d   :  { %330 = vmatprep.subr.bf16.mxu1 %v381_v1 }
  0x1e   :  { %313 = vmatpush3.bf16.msra.mxu0 %v348_v13 }
  0x20   :  { %331 = vmatpush3.bf16.msra.mxu1 %v355_v16 }
  0x21   :  { %315 = vmatmul.mubr.bf16.vlgmr.msra.gmra.mrb[0].mxu0 %v22_v15  ;;  %332 = vmatprep.subr.bf16.mxu1 %v381_v1 }
  0x24   :  { %333 = vmatpush3.bf16.msra.mxu1 %v356_v17 }
  0xf4   :  { %v128_v19 = vpop.f32.mrb[0].mxu0 }
  0xf5   :  { %v129_v20 = vadd.f32 %v262_v18, %v128_v19  ;;  %v316_v21 = vpop.f32.mrb[1].mxu0 }
  0xf6   :  { %v131_v22 = vpop.f32.mrb[2].mxu0 }
  0xf7   :  { %v134_v23 = vmax.f32 %v129_v20, 0.0  ;;  %v317_v24 = vpop.f32.mrb[3].mxu0 }
  0xf9   :  { %v135_v25 = vpack.c.bf16 %v134_v23, %v134_v23 }
  0xfb   :  { %335 = vmatmul.mubr.bf16.vlgmr.msra.gmra.mrb[0].mxu1 %v135_v25 }
 0x1ce   :  { %v241_v27 = vpop.f32.mrb[0].mxu1 }
 0x1cf   :  { %v242_v28 = vadd.f32 %v271_v26, %v241_v27  ;;  %v336_v29 = vpop.f32.mrb[1].mxu1 }
 0x1d0   :  { %v244_v30 = vpop.f32.mrb[2].mxu1 }
 0x1d1   :  { %247 = vst [vmem:[#allocation2] sm:$0x3] %v242_v28  ;;  %v337_v31 = vpop.f32.mrb[3].mxu1 }
 0x1d2   :  { %368 = shalt.err (!%p365_p4)
}
 0x1d3   :  { %s369_s4 = scalar_lea.hbm %s488_s5, 32 }
 0x1d4   :  { %p370_p5 = scmp.ne.s32.totalorder %s488_s5, %s369_s4  ;;  %p373_p6 = scmp.lt.u32.totalorder %s369_s4, %s488_s5 }
 0x1d6   :  { %p375_p7 = pnand %p373_p6, %p370_p5 }
 0x1d8   :  { %378 = shalt.err (!%p375_p7)
}
 0x1d9   :  { %257 = dma.vmem_to_hbm [thread:$0]  %s255_s30, 32, %s488_s5, [#allocation3]  }
 0x1da   :  { %379 = dma.done.wait [#allocation3], 32  }
 0x1db   :  { %380 = vsyncadd [#allocation3], 4294967264 }
 0x1dc   :  { %261 = vsyncpa [#allocation3], 1 }

</bundles_post_ra>
